<compile_context>
chip_gen: v7x
topology: tpu7x:2x2x1
jax: 0.10.0
libtpu: 0.0.40
codegen_flags: <defaults>
</compile_context>

<pallas_src>
import functools

import jax
import jax.numpy as jnp
from jax import lax
from jax.experimental import pallas as pl
from jax.experimental.pallas import tpu as pltpu

LOG_2PI = 1.8378770664093453
LR = 1e-3          # torch.optim.SGD(lr=0.001), plain SGD (no momentum)
EPS = 1e-12        # matches torch.exp(stds + 1e-12) and 1/(sqrt(.) + 1e-12)
DEN_FLOOR = 1e-30  # pg<=0: reference's 1/0 -> inf chain collapses to bonus ~0; we give ~1e-15


# ------------------------- tiny plain-JAX param prep ------------------------
def _gmm_matrices(w_row, mu_kd, s_kd):
    """Fold each component's Gaussian into one MXU contraction vs [x^2; x].

    Returns:
      p    (K, 2D): z_k(x) = p_k . [x^2; x] + cst_k  (= log pi_k + log N_k(x))
      cst  (K, 1) : per-component constant, already column-shaped for the (K,N) add
      ivar (D, K) : exp(-2*(s+eps)), transposed for the gradient math
    """
    k, d = mu_kd.shape
    log_sig = s_kd + EPS                                   # (K, D)
    inv_var = jnp.exp(-2.0 * log_sig)                      # (K, D)
    p = -0.5 * jnp.concatenate([inv_var, -2.0 * mu_kd * inv_var], axis=1)   # (K, 2D)
    log_mix = jnp.log(w_row) - jnp.log(jnp.sum(w_row))     # (1, K)
    cst = (-0.5 * (jnp.sum(mu_kd * mu_kd * inv_var + 2.0 * log_sig,
                           axis=1, keepdims=True) + float(d) * LOG_2PI)
           + log_mix.reshape(k, 1))                        # (K, 1)
    return p, cst, inv_var.T


# ------------------------------- pass A kernel ------------------------------
def _stats_update_kernel(x_ref, p_ref, cst_ref, w_ref, mu_ref, s_ref, iv_ref,
                         lp1_ref, pnew_ref, gt_acc, rrow_acc, *, n_total, d):
    i = pl.program_id(0)

    @pl.when(i == 0)
    def _init():
        gt_acc[...] = jnp.zeros_like(gt_acc)
        rrow_acc[...] = jnp.zeros_like(rrow_acc)

    xt = x_ref[...]                                        # (D, T) batch on lanes
    s_stack = jnp.concatenate([xt * xt, xt], axis=0)       # (2D, T) = 32 sublanes exact

    # log p(x) under current params: one MXU pass + (K,1) const broadcast add.
    z = lax.dot_general(p_ref[...], s_stack, (((1,), (0,)), ((), ())),
                        preferred_element_type=jnp.float32)            # (K, T)
    z = z + cst_ref[...]
    m = jnp.max(z, axis=0, keepdims=True)                  # (1, T)
    e = jnp.exp(z - m)                                     # (K, T)
    se = jnp.sum(e, axis=0, keepdims=True)                 # (1, T)
    lp1_ref[...] = m + jnp.log(se)

    # responsibilities: one exact (1,T) reciprocal + VPU mul (not a (K,T) divide).
    r = e * pl.reciprocal(se)                              # (K, T)

    # Gradient sufficient statistics (accumulated across N tiles).  Operand order
    # keeps the K=4-row operand (r) as the one the MXU transposes, not s_stack.
    gt_acc[...] += lax.dot_general(s_stack, r, (((1,), (1,)), ((), ())),
                                   preferred_element_type=jnp.float32)   # (2D, K)
    ones_row = jnp.ones_like(se)
    rrow_acc[...] += lax.dot_general(ones_row, r, (((1,), (1,)), ((), ())),
                                     preferred_element_type=jnp.float32)  # (1, K)

    @pl.when(i == pl.num_programs(0) - 1)
    def _finalize():
        inv_n = 1.0 / float(n_total)
        w = w_ref[...]                                     # (1, K)
        mu_t = mu_ref[...]                                 # (D, K)
        s_t = s_ref[...]                                   # (D, K)
        iv = iv_ref[...]                                   # (D, K)
        rtx2 = gt_acc[0:d, :]                              # sum_i r*x^2   (D, K)
        rtx = gt_acc[d:2 * d, :]                           # sum_i r*x     (D, K)
        rrow = rrow_acc[...]                               # sum_i r       (1, K)

        sum_w = jnp.sum(w, axis=-1, keepdims=True)
        g_w = -inv_n * (rrow / w - float(n_total) / sum_w)
        g_mu = -inv_n * (rtx - mu_t * rrow) * iv
        g_s = (-inv_n * (rtx2 - 2.0 * mu_t * rtx + mu_t * mu_t * rrow) * iv
               + inv_n * rrow)

        # SGD step; packed updated params -> one (2D+1, K) slab (one writeback DMA).
        pnew_ref[0:d, :] = mu_t - LR * g_mu
        pnew_ref[d:2 * d, :] = s_t - LR * g_s
        pnew_ref[2 * d:2 * d + 1, :] = w - LR * g_w
    # TODO(synk): the torch NaN checks + ipdb breakpoints have no kernel equivalent.


# ------------------------------- pass B kernel ------------------------------
def _bonus_kernel(c_ref, x_ref, lp1_ref, p_ref, cst_ref, bonus_ref):
    xt = x_ref[...]                                        # (D, T)
    s_stack = jnp.concatenate([xt * xt, xt], axis=0)       # (2D, T)

    z = lax.dot_general(p_ref[...], s_stack, (((1,), (0,)), ((), ())),
                        preferred_element_type=jnp.float32)            # (K, T)
    z = z + cst_ref[...]
    m = jnp.max(z, axis=0, keepdims=True)
    lp2 = m + jnp.log(jnp.sum(jnp.exp(z - m), axis=0, keepdims=True))  # (1, T)

    pg = lp2 - lp1_ref[...]                                            # (1, T)
    # count coefficient: ONE (1,1) EUP rsqrt, broadcast-multiplied.
    coef = 0.1 * lax.rsqrt(jnp.full((1, 1), c_ref[0], dtype=jnp.float32))
    den = jnp.exp(coef * jnp.maximum(pg, 0.0)) - 1.0
    den = jnp.maximum(den, DEN_FLOOR)
    # fused epilogue: 1/(sqrt(1/den)+eps) == 1/(rsqrt(den)+eps)
    bonus_ref[...] = pl.reciprocal(lax.rsqrt(den) + EPS, approx=True)


# --------------------------------- wrapper ----------------------------------
def _pick_tile(n):
    for t in (2048, 1536, 1024, 768, 512, 384, 256, 128):
        if n % t == 0:
            return t
    return n   # small / awkward batches: a single lane-dense tile


@jax.jit
def pseudocounts_forward(ob_no, ws, means, stds, c):
    """Returns (bonus, ws_new, means_new, stds_new, c_new)."""
    ob_no = ob_no.astype(jnp.float32)
    n, d = ob_no.shape
    k = ws.shape[0]
    c_new = (jnp.asarray(c, jnp.float32).reshape(()) + jnp.float32(n)).reshape(1)

    # Layout plumbing: batch on lanes; params in (K,D) for the MXU matrix / const
    # column and in (D,K) for the gradient math.
    xt = ob_no.T                                   # (D, N)
    w_row = ws.astype(jnp.float32).reshape(1, k)   # (1, K)
    mu_kd = means.astype(jnp.float32)              # (K, D)
    s_kd = stds.astype(jnp.float32)                # (K, D)
    mu_t = mu_kd.T                                 # (D, K)
    s_t = s_kd.T                                   # (D, K)

    p1, cst1, iv1 = _gmm_matrices(w_row, mu_kd, s_kd)   # (K,2D), (K,1), (D,K)

    tile_n = _pick_tile(n)
    n_tiles = n // tile_n
    resident = lambda i: (0, 0)

    ce_a = pl.CostEstimate(
        flops=int(4 * n * 2 * d * k + 12 * n * k),
        transcendentals=int(n * (k + 2)),
        bytes_accessed=int(4 * (n * d + n + (2 * d + 1) * k + 5 * d * k + 4 * k)))

    lp1, pslab = pl.pallas_call(
        functools.partial(_stats_update_kernel, n_total=n, d=d),
        out_shape=(
            jax.ShapeDtypeStruct((1, n), jnp.float32),          # lp1 (lane-dense row)
            jax.ShapeDtypeStruct((2 * d + 1, k), jnp.float32),  # packed updated params
        ),
        grid=(n_tiles,),
        in_specs=[
            pl.BlockSpec((d, tile_n), lambda i: (0, i)),        # x tile
            pl.BlockSpec((k, 2 * d), resident),                 # p1
            pl.BlockSpec((k, 1), resident),                     # const1
            pl.BlockSpec((1, k), resident),                     # w
            pl.BlockSpec((d, k), resident),                     # mu^T
            pl.BlockSpec((d, k), resident),                     # s^T
            pl.BlockSpec((d, k), resident),                     # inv_var^T
        ],
        out_specs=(
            pl.BlockSpec((1, tile_n), lambda i: (0, i)),
            pl.BlockSpec((2 * d + 1, k), resident),
        ),
        scratch_shapes=[
            pltpu.VMEM((2 * d, k), jnp.float32),   # sum_i r*[x^2; x]
            pltpu.VMEM((1, k), jnp.float32),       # sum_i r
        ],
        compiler_params=pltpu.CompilerParams(
            dimension_semantics=("arbitrary",)),   # N axis carries the grad accumulation
        cost_estimate=ce_a,
    )(xt, p1, cst1, w_row, mu_t, s_t, iv1)

    mu2_t = pslab[0:d, :]
    s2_t = pslab[d:2 * d, :]
    w2_row = pslab[2 * d:2 * d + 1, :]

    p2, cst2, _ = _gmm_matrices(w2_row, mu2_t.T, s2_t.T)

    ce_b = pl.CostEstimate(
        flops=int(2 * n * 2 * d * k + 10 * n),
        transcendentals=int(n * (k + 3)),
        bytes_accessed=int(4 * (n * d + 2 * n + (2 * d + 1) * k)))

    bonus = pl.pallas_call(
        _bonus_kernel,
        out_shape=jax.ShapeDtypeStruct((1, n), jnp.float32),
        grid=(n_tiles,),
        in_specs=[
            pl.BlockSpec(memory_space=pltpu.MemorySpace.SMEM),   # c (scalar)
            pl.BlockSpec((d, tile_n), lambda i: (0, i)),
            pl.BlockSpec((1, tile_n), lambda i: (0, i)),
            pl.BlockSpec((k, 2 * d), resident),
            pl.BlockSpec((k, 1), resident),
        ],
        out_specs=pl.BlockSpec((1, tile_n), lambda i: (0, i)),
        compiler_params=pltpu.CompilerParams(
            dimension_semantics=("parallel",)),    # independent tiles (2 TCs on v7x)
        cost_estimate=ce_b,
    )(c_new, xt, lp1, p2, cst2)

    return bonus[0], w2_row.reshape(k), mu2_t.T, s2_t.T, c_new[0]


# ------------------------- pure-JAX reference -------------------------------
def _gmm_logprob_ref(x, w, mu, s):
    scale = jnp.exp(s + EPS)
    log_mix = jnp.log(w) - jnp.log(jnp.sum(w))
    diff = (x[:, None, :] - mu[None, :, :]) / scale[None, :, :]
    comp = (-0.5 * jnp.sum(diff * diff, axis=-1)
            - jnp.sum(jnp.log(scale), axis=-1)[None, :]
            - 0.5 * x.shape[1] * LOG_2PI)
    return jax.scipy.special.logsumexp(comp + log_mix[None, :], axis=-1)


def pseudocounts_forward_ref(ob_no, ws, means, stds, c):
    n = ob_no.shape[0]
    c_new = c + jnp.float32(n)
    lp1 = _gmm_logprob_ref(ob_no, ws, means, stds)
    loss = lambda p: -jnp.mean(_gmm_logprob_ref(ob_no, p[0], p[1], p[2]))
    g_w, g_mu, g_s = jax.grad(loss)((ws, means, stds))
    w2, mu2, s2 = ws - LR * g_w, means - LR * g_mu, stds - LR * g_s
    lp2 = _gmm_logprob_ref(ob_no, w2, mu2, s2)
    pg = lp2 - lp1
    coef = 0.1 * c_new ** -0.5
    bonus = 1.0 / (jnp.exp(coef * jnp.maximum(pg, 0.0)) - 1.0)
    bonus = jnp.maximum(bonus, 0.0)
    bonus = 1.0 / (jnp.sqrt(bonus) + EPS)
    return bonus, w2, mu2, s2, c_new


if __name__ == "__main__":
    key = jax.random.PRNGKey(0)
    k_means, k_obs = jax.random.split(key)
    N, OB_DIM, N_DIST = 8, 16, 4            # hparams['ob_dim'] = 16, n_dist = 4

    # deterministic parameter init mirroring __init__
    ws = jnp.ones((N_DIST,), jnp.float32)                              # torch.ones
    means = jax.random.normal(k_means, (N_DIST, OB_DIM), jnp.float32)  # torch.randn
    stds = jnp.zeros((N_DIST, OB_DIM), jnp.float32)                    # torch.zeros
    c = jnp.zeros((), jnp.float32)                                     # torch.zeros(1)
    ob_no = jax.random.normal(k_obs, (N, OB_DIM), jnp.float32)

    bonus, w2, mu2, s2, c_new = pseudocounts_forward(ob_no, ws, means, stds, c)
    jax.block_until_ready(bonus)

    b_ref, w_ref_, mu_ref_, s_ref_, c_ref_ = pseudocounts_forward_ref(
        ob_no, ws, means, stds, c)

    assert bonus.shape == (N,)
    assert bool(jnp.all(jnp.isfinite(bonus)))
    assert jnp.allclose(w2, w_ref_, atol=1e-5, rtol=1e-4)
    assert jnp.allclose(mu2, mu_ref_, atol=1e-5, rtol=1e-4)
    assert jnp.allclose(s2, s_ref_, atol=1e-5, rtol=1e-4)
    assert jnp.allclose(c_new, c_ref_)
    assert jnp.allclose(bonus, b_ref, atol=5e-3, rtol=2e-1)
    print("KERNEL_OK")
</pallas_src>

<mosaic_0001>
module attributes {stable_mosaic.version = 11 : i64} {
  func.func @_stats_update_kernel(%arg0: i32, %arg1: memref<16x8xf32, #tpu.memory_space<vmem>>, %arg2: memref<4x32xf32, #tpu.memory_space<vmem>>, %arg3: memref<4x1xf32, #tpu.memory_space<vmem>>, %arg4: memref<1x4xf32, #tpu.memory_space<vmem>>, %arg5: memref<16x4xf32, #tpu.memory_space<vmem>>, %arg6: memref<16x4xf32, #tpu.memory_space<vmem>>, %arg7: memref<16x4xf32, #tpu.memory_space<vmem>>, %arg8: memref<1x8xf32, #tpu.memory_space<vmem>>, %arg9: memref<33x4xf32, #tpu.memory_space<vmem>>, %arg10: memref<32x4xf32, #tpu.memory_space<vmem>>, %arg11: memref<1x4xf32, #tpu.memory_space<vmem>>) attributes {dimension_semantics = [#tpu.dimension_semantics<arbitrary>], iteration_bounds = array<i64: 1>, scalar_prefetch = 0 : i64, scratch_operands = 2 : i64, tpu.core_type = #tpu.core_type<tc>, window_params = [{transform_indices = @transform_0, window_bounds = array<i64: 16, 8>}, {pipeline_mode = #tpu.pipeline_mode<synchronous>, transform_indices = @transform_1, window_bounds = array<i64: 4, 32>}, {pipeline_mode = #tpu.pipeline_mode<synchronous>, transform_indices = @transform_2, window_bounds = array<i64: 4, 1>}, {pipeline_mode = #tpu.pipeline_mode<synchronous>, transform_indices = @transform_3, window_bounds = array<i64: 1, 4>}, {pipeline_mode = #tpu.pipeline_mode<synchronous>, transform_indices = @transform_4, window_bounds = array<i64: 16, 4>}, {pipeline_mode = #tpu.pipeline_mode<synchronous>, transform_indices = @transform_5, window_bounds = array<i64: 16, 4>}, {pipeline_mode = #tpu.pipeline_mode<synchronous>, transform_indices = @transform_6, window_bounds = array<i64: 16, 4>}, {transform_indices = @transform_7, window_bounds = array<i64: 1, 8>}, {pipeline_mode = #tpu.pipeline_mode<synchronous>, transform_indices = @transform_8, window_bounds = array<i64: 33, 4>}]} {
    %c0_i32 = arith.constant 0 : i32
    %0 = arith.cmpi eq, %arg0, %c0_i32 : i32
    %1 = arith.extui %0 : i1 to i32
    %c0_i32_0 = arith.constant 0 : i32
    %2 = arith.cmpi ne, %1, %c0_i32_0 : i32
    scf.if %2 {
      %cst_23 = arith.constant 0.000000e+00 : f32
      %36 = vector.broadcast %cst_23 : f32 to vector<32x4xf32>
      %c0_24 = arith.constant 0 : index
      %c0_25 = arith.constant 0 : index
      %37 = vector.load %arg10[%c0_24, %c0_25] : memref<32x4xf32, #tpu.memory_space<vmem>>, vector<32x4xf32>
      tpu.vector_store %arg10[%c0_24, %c0_25], %36 {strides = array<i32>} : memref<32x4xf32, #tpu.memory_space<vmem>>, vector<32x4xf32>,
      %cst_26 = arith.constant 0.000000e+00 : f32
      %38 = vector.broadcast %cst_26 : f32 to vector<1x4xf32>
      %c0_27 = arith.constant 0 : index
      %c0_28 = arith.constant 0 : index
      %39 = vector.load %arg11[%c0_27, %c0_28] : memref<1x4xf32, #tpu.memory_space<vmem>>, vector<1x4xf32>
      tpu.vector_store %arg11[%c0_27, %c0_28], %38 {strides = array<i32>} : memref<1x4xf32, #tpu.memory_space<vmem>>, vector<1x4xf32>,
    } else {
    }
    %c0 = arith.constant 0 : index
    %c0_1 = arith.constant 0 : index
    %3 = vector.load %arg1[%c0, %c0_1] : memref<16x8xf32, #tpu.memory_space<vmem>>, vector<16x8xf32>
    %4 = arith.mulf %3, %3 : vector<16x8xf32>
    %5 = tpu.concatenate %4, %3 in 0 : vector<16x8xf32>, vector<16x8xf32> -> vector<32x8xf32>
    %c0_2 = arith.constant 0 : index
    %c0_3 = arith.constant 0 : index
    %6 = vector.load %arg2[%c0_2, %c0_3] : memref<4x32xf32, #tpu.memory_space<vmem>>, vector<4x32xf32>
    %cst = arith.constant dense<0.000000e+00> : vector<4x8xf32>
    %7 = tpu.matmul %6, %5, %cst {dimension_numbers = #tpu.dot_dimension_numbers<[1], [0], [0], [1], [0, 0, 1, 1], [], []>} : vector<4x32xf32>, vector<32x8xf32>, vector<4x8xf32> -> vector<4x8xf32>
    %c0_4 = arith.constant 0 : index
    %c0_5 = arith.constant 0 : index
    %8 = vector.load %arg3[%c0_4, %c0_5] : memref<4x1xf32, #tpu.memory_space<vmem>>, vector<4x1xf32>
    %9 = vector.broadcast %8 : vector<4x1xf32> to vector<4x8xf32>
    %10 = arith.addf %7, %9 : vector<4x8xf32>
    %cst_6 = arith.constant dense<0xFF800000> : vector<8xf32>
    %11 = vector.multi_reduction <maximumf>, %10, %cst_6 [0] : vector<4x8xf32> to vector<8xf32>
    %12 = vector.shape_cast %11 : vector<8xf32> to vector<1x8xf32>
    %13 = vector.broadcast %12 : vector<1x8xf32> to vector<4x8xf32>
    %14 = arith.subf %10, %13 : vector<4x8xf32>
    %15 = math.exp %14 : vector<4x8xf32>
    %cst_7 = arith.constant dense<0.000000e+00> : vector<8xf32>
    %16 = vector.multi_reduction <add>, %15, %cst_7 [0] : vector<4x8xf32> to vector<8xf32>
    %17 = vector.shape_cast %16 : vector<8xf32> to vector<1x8xf32>
    %18 = math.log %17 : vector<1x8xf32>
    %19 = arith.addf %12, %18 : vector<1x8xf32>
    %c0_8 = arith.constant 0 : index
    %c0_9 = arith.constant 0 : index
    %20 = vector.load %arg8[%c0_8, %c0_9] : memref<1x8xf32, #tpu.memory_space<vmem>>, vector<1x8xf32>
    tpu.vector_store %arg8[%c0_8, %c0_9], %19 {strides = array<i32>} : memref<1x8xf32, #tpu.memory_space<vmem>>, vector<1x8xf32>,
    %21 = tpu.reciprocal %17 : vector<1x8xf32> -> vector<1x8xf32>
    %22 = vector.broadcast %21 : vector<1x8xf32> to vector<4x8xf32>
    %23 = arith.mulf %15, %22 : vector<4x8xf32>
    %c0_10 = arith.constant 0 : index
    %c0_11 = arith.constant 0 : index
    %24 = vector.load %arg10[%c0_10, %c0_11] : memref<32x4xf32, #tpu.memory_space<vmem>>, vector<32x4xf32>
    %cst_12 = arith.constant dense<0.000000e+00> : vector<32x4xf32>
    %25 = tpu.matmul %5, %23, %cst_12 {dimension_numbers = #tpu.dot_dimension_numbers<[1], [1], [0], [0], [0, 0, 1, 0], [], []>} : vector<32x8xf32>, vector<4x8xf32>, vector<32x4xf32> -> vector<32x4xf32>
    %26 = arith.addf %24, %25 : vector<32x4xf32>
    %c0_13 = arith.constant 0 : index
    %c0_14 = arith.constant 0 : index
    %27 = vector.load %arg10[%c0_13, %c0_14] : memref<32x4xf32, #tpu.memory_space<vmem>>, vector<32x4xf32>
    tpu.vector_store %arg10[%c0_13, %c0_14], %26 {strides = array<i32>} : memref<32x4xf32, #tpu.memory_space<vmem>>, vector<32x4xf32>,
    %cst_15 = arith.constant 1.000000e+00 : f32
    %28 = vector.broadcast %cst_15 : f32 to vector<1x8xf32>
    %c0_16 = arith.constant 0 : index
    %c0_17 = arith.constant 0 : index
    %29 = vector.load %arg11[%c0_16, %c0_17] : memref<1x4xf32, #tpu.memory_space<vmem>>, vector<1x4xf32>
    %cst_18 = arith.constant dense<0.000000e+00> : vector<1x4xf32>
    %30 = tpu.matmul %28, %23, %cst_18 {dimension_numbers = #tpu.dot_dimension_numbers<[1], [1], [0], [0], [0, 0, 1, 0], [], []>} : vector<1x8xf32>, vector<4x8xf32>, vector<1x4xf32> -> vector<1x4xf32>
    %31 = arith.addf %29, %30 : vector<1x4xf32>
    %c0_19 = arith.constant 0 : index
    %c0_20 = arith.constant 0 : index
    %32 = vector.load %arg11[%c0_19, %c0_20] : memref<1x4xf32, #tpu.memory_space<vmem>>, vector<1x4xf32>
    tpu.vector_store %arg11[%c0_19, %c0_20], %31 {strides = array<i32>} : memref<1x4xf32, #tpu.memory_space<vmem>>, vector<1x4xf32>,
    %c0_i32_21 = arith.constant 0 : i32
    %33 = arith.cmpi eq, %arg0, %c0_i32_21 : i32
    %34 = arith.extui %33 : i1 to i32
    %c0_i32_22 = arith.constant 0 : i32
    %35 = arith.cmpi ne, %34, %c0_i32_22 : i32
    scf.if %35 {
      %c0_23 = arith.constant 0 : index
      %c0_24 = arith.constant 0 : index
      %36 = vector.load %arg4[%c0_23, %c0_24] : memref<1x4xf32, #tpu.memory_space<vmem>>, vector<1x4xf32>
      %c0_25 = arith.constant 0 : index
      %c0_26 = arith.constant 0 : index
      %37 = vector.load %arg5[%c0_25, %c0_26] : memref<16x4xf32, #tpu.memory_space<vmem>>, vector<16x4xf32>
      %c0_27 = arith.constant 0 : index
      %c0_28 = arith.constant 0 : index
      %38 = vector.load %arg6[%c0_27, %c0_28] : memref<16x4xf32, #tpu.memory_space<vmem>>, vector<16x4xf32>
      %c0_29 = arith.constant 0 : index
      %c0_30 = arith.constant 0 : index
      %39 = vector.load %arg7[%c0_29, %c0_30] : memref<16x4xf32, #tpu.memory_space<vmem>>, vector<16x4xf32>
      %c0_31 = arith.constant 0 : index
      %c0_32 = arith.constant 0 : index
      %40 = vector.load %arg10[%c0_31, %c0_32] : memref<32x4xf32, #tpu.memory_space<vmem>>, vector<16x4xf32>
      %c16 = arith.constant 16 : index
      %c0_33 = arith.constant 0 : index
      %41 = vector.load %arg10[%c16, %c0_33] : memref<32x4xf32, #tpu.memory_space<vmem>>, vector<16x4xf32>
      %c0_34 = arith.constant 0 : index
      %c0_35 = arith.constant 0 : index
      %42 = vector.load %arg11[%c0_34, %c0_35] : memref<1x4xf32, #tpu.memory_space<vmem>>, vector<1x4xf32>
      %cst_36 = arith.constant dense<0.000000e+00> : vector<1xf32>
      %43 = vector.multi_reduction <add>, %36, %cst_36 [1] : vector<1x4xf32> to vector<1xf32>
      %44 = vector.shape_cast %43 : vector<1xf32> to vector<1x1xf32>
      %45 = arith.divf %42, %36 : vector<1x4xf32>
      %cst_37 = arith.constant 8.000000e+00 : f32
      %46 = vector.broadcast %cst_37 : f32 to vector<1x1xf32>
      %47 = arith.divf %46, %44 : vector<1x1xf32>
      %48 = vector.broadcast %47 : vector<1x1xf32> to vector<1x4xf32>
      %49 = arith.subf %45, %48 : vector<1x4xf32>
      %cst_38 = arith.constant -1.250000e-01 : f32
      %50 = vector.broadcast %cst_38 : f32 to vector<1x4xf32>
      %51 = arith.mulf %50, %49 : vector<1x4xf32>
      %52 = vector.broadcast %42 : vector<1x4xf32> to vector<16x4xf32>
      %53 = arith.mulf %37, %52 : vector<16x4xf32>
      %54 = arith.subf %41, %53 : vector<16x4xf32>
      %cst_39 = arith.constant -1.250000e-01 : f32
      %55 = vector.broadcast %cst_39 : f32 to vector<16x4xf32>
      %56 = arith.mulf %55, %54 : vector<16x4xf32>
      %57 = arith.mulf %56, %39 : vector<16x4xf32>
      %cst_40 = arith.constant 2.000000e+00 : f32
      %58 = vector.broadcast %cst_40 : f32 to vector<16x4xf32>
      %59 = arith.mulf %58, %37 : vector<16x4xf32>
      %60 = arith.mulf %59, %41 : vector<16x4xf32>
      %61 = arith.subf %40, %60 : vector<16x4xf32>
      %62 = arith.mulf %37, %37 : vector<16x4xf32>
      %63 = vector.broadcast %42 : vector<1x4xf32> to vector<16x4xf32>
      %64 = arith.mulf %62, %63 : vector<16x4xf32>
      %65 = arith.addf %61, %64 : vector<16x4xf32>
      %cst_41 = arith.constant -1.250000e-01 : f32
      %66 = vector.broadcast %cst_41 : f32 to vector<16x4xf32>
      %67 = arith.mulf %66, %65 : vector<16x4xf32>
      %68 = arith.mulf %67, %39 : vector<16x4xf32>
      %cst_42 = arith.constant 1.250000e-01 : f32
      %69 = vector.broadcast %cst_42 : f32 to vector<1x4xf32>
      %70 = arith.mulf %69, %42 : vector<1x4xf32>
      %71 = vector.broadcast %70 : vector<1x4xf32> to vector<16x4xf32>
      %72 = arith.addf %68, %71 : vector<16x4xf32>
      %cst_43 = arith.constant 1.000000e-03 : f32
      %73 = vector.broadcast %cst_43 : f32 to vector<16x4xf32>
      %74 = arith.mulf %73, %57 : vector<16x4xf32>
      %75 = arith.subf %37, %74 : vector<16x4xf32>
      %c0_44 = arith.constant 0 : index
      %c0_45 = arith.constant 0 : index
      %76 = vector.load %arg9[%c0_44, %c0_45] : memref<33x4xf32, #tpu.memory_space<vmem>>, vector<16x4xf32>
      tpu.vector_store %arg9[%c0_44, %c0_45], %75 {strides = array<i32>} : memref<33x4xf32, #tpu.memory_space<vmem>>, vector<16x4xf32>,
      %cst_46 = arith.constant 1.000000e-03 : f32
      %77 = vector.broadcast %cst_46 : f32 to vector<16x4xf32>
      %78 = arith.mulf %77, %72 : vector<16x4xf32>
      %79 = arith.subf %38, %78 : vector<16x4xf32>
      %c16_47 = arith.constant 16 : index
      %c0_48 = arith.constant 0 : index
      %80 = vector.load %arg9[%c16_47, %c0_48] : memref<33x4xf32, #tpu.memory_space<vmem>>, vector<16x4xf32>
      tpu.vector_store %arg9[%c16_47, %c0_48], %79 {strides = array<i32>} : memref<33x4xf32, #tpu.memory_space<vmem>>, vector<16x4xf32>,
      %cst_49 = arith.constant 1.000000e-03 : f32
      %81 = vector.broadcast %cst_49 : f32 to vector<1x4xf32>
      %82 = arith.mulf %81, %51 : vector<1x4xf32>
      %83 = arith.subf %36, %82 : vector<1x4xf32>
      %c32 = arith.constant 32 : index
      %c0_50 = arith.constant 0 : index
      %84 = vector.load %arg9[%c32, %c0_50] : memref<33x4xf32, #tpu.memory_space<vmem>>, vector<1x4xf32>
      tpu.vector_store %arg9[%c32, %c0_50], %83 {strides = array<i32>} : memref<33x4xf32, #tpu.memory_space<vmem>>, vector<1x4xf32>,
    } else {
    }
    return
  }
  func.func @transform_0(%arg0: i32) -> (i32, i32) {
    %c0_i32 = arith.constant 0 : i32
    %c0_i32_0 = arith.constant 0 : i32
    return %c0_i32, %arg0 : i32, i32
  }
  func.func @transform_1(%arg0: i32) -> (i32, i32) {
    %c0_i32 = arith.constant 0 : i32
    %c0_i32_0 = arith.constant 0 : i32
    %c0_i32_1 = arith.constant 0 : i32
    return %c0_i32, %c0_i32_0 : i32, i32
  }
  func.func @transform_2(%arg0: i32) -> (i32, i32) {
    %c0_i32 = arith.constant 0 : i32
    %c0_i32_0 = arith.constant 0 : i32
    %c0_i32_1 = arith.constant 0 : i32
    return %c0_i32, %c0_i32_0 : i32, i32
  }
  func.func @transform_3(%arg0: i32) -> (i32, i32) {
    %c0_i32 = arith.constant 0 : i32
    %c0_i32_0 = arith.constant 0 : i32
    %c0_i32_1 = arith.constant 0 : i32
    return %c0_i32, %c0_i32_0 : i32, i32
  }
  func.func @transform_4(%arg0: i32) -> (i32, i32) {
    %c0_i32 = arith.constant 0 : i32
    %c0_i32_0 = arith.constant 0 : i32
    %c0_i32_1 = arith.constant 0 : i32
    return %c0_i32, %c0_i32_0 : i32, i32
  }
  func.func @transform_5(%arg0: i32) -> (i32, i32) {
    %c0_i32 = arith.constant 0 : i32
    %c0_i32_0 = arith.constant 0 : i32
    %c0_i32_1 = arith.constant 0 : i32
    return %c0_i32, %c0_i32_0 : i32, i32
  }
  func.func @transform_6(%arg0: i32) -> (i32, i32) {
    %c0_i32 = arith.constant 0 : i32
    %c0_i32_0 = arith.constant 0 : i32
    %c0_i32_1 = arith.constant 0 : i32
    return %c0_i32, %c0_i32_0 : i32, i32
  }
  func.func @transform_7(%arg0: i32) -> (i32, i32) {
    %c0_i32 = arith.constant 0 : i32
    %c0_i32_0 = arith.constant 0 : i32
    return %c0_i32, %arg0 : i32, i32
  }
  func.func @transform_8(%arg0: i32) -> (i32, i32) {
    %c0_i32 = arith.constant 0 : i32
    %c0_i32_0 = arith.constant 0 : i32
    %c0_i32_1 = arith.constant 0 : i32
    return %c0_i32, %c0_i32_0 : i32, i32
  }
}

module attributes {stable_mosaic.version = 11 : i64} {
  func.func @_bonus_kernel(%arg0: i32, %arg1: memref<1xf32, #tpu.memory_space<smem>>, %arg2: memref<16x8xf32, #tpu.memory_space<vmem>>, %arg3: memref<1x8xf32, #tpu.memory_space<vmem>>, %arg4: memref<4x32xf32, #tpu.memory_space<vmem>>, %arg5: memref<4x1xf32, #tpu.memory_space<vmem>>, %arg6: memref<1x8xf32, #tpu.memory_space<vmem>>) attributes {dimension_semantics = [#tpu.dimension_semantics<parallel>], iteration_bounds = array<i64: 1>, scalar_prefetch = 0 : i64, scratch_operands = 0 : i64, tpu.core_type = #tpu.core_type<tc>, window_params = [{transform_indices = @transform_0, window_bounds = array<i64: 1>}, {transform_indices = @transform_1, window_bounds = array<i64: 16, 8>}, {transform_indices = @transform_2, window_bounds = array<i64: 1, 8>}, {pipeline_mode = #tpu.pipeline_mode<synchronous>, transform_indices = @transform_3, window_bounds = array<i64: 4, 32>}, {pipeline_mode = #tpu.pipeline_mode<synchronous>, transform_indices = @transform_4, window_bounds = array<i64: 4, 1>}, {transform_indices = @transform_5, window_bounds = array<i64: 1, 8>}]} {
    %c0 = arith.constant 0 : index
    %c0_0 = arith.constant 0 : index
    %0 = vector.load %arg2[%c0, %c0_0] : memref<16x8xf32, #tpu.memory_space<vmem>>, vector<16x8xf32>
    %1 = arith.mulf %0, %0 : vector<16x8xf32>
    %2 = tpu.concatenate %1, %0 in 0 : vector<16x8xf32>, vector<16x8xf32> -> vector<32x8xf32>
    %c0_1 = arith.constant 0 : index
    %c0_2 = arith.constant 0 : index
    %3 = vector.load %arg4[%c0_1, %c0_2] : memref<4x32xf32, #tpu.memory_space<vmem>>, vector<4x32xf32>
    %cst = arith.constant dense<0.000000e+00> : vector<4x8xf32>
    %4 = tpu.matmul %3, %2, %cst {dimension_numbers = #tpu.dot_dimension_numbers<[1], [0], [0], [1], [0, 0, 1, 1], [], []>} : vector<4x32xf32>, vector<32x8xf32>, vector<4x8xf32> -> vector<4x8xf32>
    %c0_3 = arith.constant 0 : index
    %c0_4 = arith.constant 0 : index
    %5 = vector.load %arg5[%c0_3, %c0_4] : memref<4x1xf32, #tpu.memory_space<vmem>>, vector<4x1xf32>
    %6 = vector.broadcast %5 : vector<4x1xf32> to vector<4x8xf32>
    %7 = arith.addf %4, %6 : vector<4x8xf32>
    %cst_5 = arith.constant dense<0xFF800000> : vector<8xf32>
    %8 = vector.multi_reduction <maximumf>, %7, %cst_5 [0] : vector<4x8xf32> to vector<8xf32>
    %9 = vector.shape_cast %8 : vector<8xf32> to vector<1x8xf32>
    %10 = vector.broadcast %9 : vector<1x8xf32> to vector<4x8xf32>
    %11 = arith.subf %7, %10 : vector<4x8xf32>
    %12 = math.exp %11 : vector<4x8xf32>
    %cst_6 = arith.constant dense<0.000000e+00> : vector<8xf32>
    %13 = vector.multi_reduction <add>, %12, %cst_6 [0] : vector<4x8xf32> to vector<8xf32>
    %14 = vector.shape_cast %13 : vector<8xf32> to vector<1x8xf32>
    %15 = math.log %14 : vector<1x8xf32>
    %16 = arith.addf %9, %15 : vector<1x8xf32>
    %c0_7 = arith.constant 0 : index
    %c0_8 = arith.constant 0 : index
    %17 = vector.load %arg3[%c0_7, %c0_8] : memref<1x8xf32, #tpu.memory_space<vmem>>, vector<1x8xf32>
    %18 = arith.subf %16, %17 : vector<1x8xf32>
    %c0_9 = arith.constant 0 : index
    %19 = memref.load %arg1[%c0_9] : memref<1xf32, #tpu.memory_space<smem>>
    %20 = vector.broadcast %19 : f32 to vector<1x1xf32>
    %21 = math.rsqrt %20 : vector<1x1xf32>
    %cst_10 = arith.constant 1.000000e-01 : f32
    %22 = vector.broadcast %cst_10 : f32 to vector<1x1xf32>
    %23 = arith.mulf %22, %21 : vector<1x1xf32>
    %cst_11 = arith.constant 0.000000e+00 : f32
    %24 = vector.broadcast %cst_11 : f32 to vector<1x8xf32>
    %25 = arith.maximumf %18, %24 : vector<1x8xf32>
    %26 = vector.broadcast %23 : vector<1x1xf32> to vector<1x8xf32>
    %27 = arith.mulf %26, %25 : vector<1x8xf32>
    %28 = math.exp %27 : vector<1x8xf32>
    %cst_12 = arith.constant 1.000000e+00 : f32
    %29 = vector.broadcast %cst_12 : f32 to vector<1x8xf32>
    %30 = arith.subf %28, %29 : vector<1x8xf32>
    %cst_13 = arith.constant 1.000000e-30 : f32
    %31 = vector.broadcast %cst_13 : f32 to vector<1x8xf32>
    %32 = arith.maximumf %30, %31 : vector<1x8xf32>
    %33 = math.rsqrt %32 : vector<1x8xf32>
    %cst_14 = arith.constant 9.99999996E-13 : f32
    %34 = vector.broadcast %cst_14 : f32 to vector<1x8xf32>
    %35 = arith.addf %33, %34 : vector<1x8xf32>
    %36 = tpu.reciprocal %35 {approx = true} : vector<1x8xf32> -> vector<1x8xf32>
    %c0_15 = arith.constant 0 : index
    %c0_16 = arith.constant 0 : index
    %37 = vector.load %arg6[%c0_15, %c0_16] : memref<1x8xf32, #tpu.memory_space<vmem>>, vector<1x8xf32>
    tpu.vector_store %arg6[%c0_15, %c0_16], %36 {strides = array<i32>} : memref<1x8xf32, #tpu.memory_space<vmem>>, vector<1x8xf32>,
    return
  }
  func.func @transform_0(%arg0: i32) -> i32 {
    %c0_i32 = arith.constant 0 : i32
    %c0_i32_0 = arith.constant 0 : i32
    return %c0_i32 : i32
  }
  func.func @transform_1(%arg0: i32) -> (i32, i32) {
    %c0_i32 = arith.constant 0 : i32
    %c0_i32_0 = arith.constant 0 : i32
    return %c0_i32, %arg0 : i32, i32
  }
  func.func @transform_2(%arg0: i32) -> (i32, i32) {
    %c0_i32 = arith.constant 0 : i32
    %c0_i32_0 = arith.constant 0 : i32
    return %c0_i32, %arg0 : i32, i32
  }
  func.func @transform_3(%arg0: i32) -> (i32, i32) {
    %c0_i32 = arith.constant 0 : i32
    %c0_i32_0 = arith.constant 0 : i32
    %c0_i32_1 = arith.constant 0 : i32
    return %c0_i32, %c0_i32_0 : i32, i32
  }
  func.func @transform_4(%arg0: i32) -> (i32, i32) {
    %c0_i32 = arith.constant 0 : i32
    %c0_i32_0 = arith.constant 0 : i32
    %c0_i32_1 = arith.constant 0 : i32
    return %c0_i32, %c0_i32_0 : i32, i32
  }
  func.func @transform_5(%arg0: i32) -> (i32, i32) {
    %c0_i32 = arith.constant 0 : i32
    %c0_i32_0 = arith.constant 0 : i32
    return %c0_i32, %arg0 : i32, i32
  }
}

</mosaic_0001>

<bundles_post_ra>
// kernel: pseudocounts_forward.2
= control target key start
LH: loop header
LB: loop body
LE: loop exit
PB: predicated region body
PF: predicated region fallthrough
CT: control target
= control target key end

     0   :  { %v492_v0 = vmov 0.0|0.0   ;;  %vm493_vm0 = vmmov 0   ;;  %v494_v3 = vmov 0.0   ;;  %v495_v6 = vmov 0   ;;  %s640_s0 = inlined_call_operand.vmem [shape: f32[16,8], index: 0, kind: input, shape index: {}]   ;;  %s641_s2 = inlined_call_operand.vmem [shape: f32[4,1], index: 2, kind: input, shape index: {}]   ;;  %s642_s1 = inlined_call_operand.vmem [shape: f32[4,32], index: 1, kind: input, shape index: {}]   ;;  %s643_s3 = inlined_call_operand.vmem [shape: f32[1,4], index: 3, kind: input, shape index: {}]   ;;  %s644_s7 = inlined_call_operand.vmem [shape: f32[1,8], index: 7, kind: output, shape index: {0}]   ;;  %s645_s4 = inlined_call_operand.vmem [shape: f32[16,4], index: 4, kind: input, shape index: {}]   ;;  %s646_s6 = inlined_call_operand.vmem [shape: f32[16,4], index: 6, kind: input, shape index: {}]   ;;  %s647_s8 = inlined_call_operand.vmem [shape: f32[33,4], index: 8, kind: output, shape index: {1}]   ;;  %s648_s5 = inlined_call_operand.vmem [shape: f32[16,4], index: 5, kind: input, shape index: {}]  }
   0x1   :  { %470 = vmatprep.subr.bf16.mxu0 %v492_v0  ;;  %v545_v1 = vld [vmem:[%s640_s0] sm:$0xff]  ;;  %v550_v2 = vld [vmem:[%s640_s0 + $0x8] sm:$0xff]  ;;  %454 = vmatprep.mubr.msk.f32.mxu0 %vm493_vm0, %v494_v3  ;;  %vm50_vm1 = vcmask 261120   ;;  %vm153_vm2 = vcmask 64512   ;;  %vm37_vm3 = vcmask 24576   ;;  %vm32_vm4 = vcmask 31744  }
   0x2   :  { %v41_v4 = vmul.f32 %v545_v1, %v545_v1  ;;  %v557_v5 = vmul.f32 %v550_v2, %v550_v2  ;;  %481 = vset.pattern.permute.xlu0 %v495_v6  ;;  %v44_v7 = vld [vmem:[%s641_s2] sm:$0xf]  ;;  %v474_v9 = vpack.c.bf16 %v550_v2, %v545_v1  ;;  %38 = vst.msk [vmem:[#allocation3] sm:$0x1] %vm37_vm3, %v494_v3  ;;  %vm124_vm5 = vcmask 60416   ;;  %v345_v63 = vld [vmem:[%s645_s4 + $0x8] sm:$0xff] }
   0x3   :  { %47 = vperm.xlu0 %481, %v44_v7   ;;  %v43_v10 = vld [vmem:[%s642_s1] sm:$0xf]  ;;  %34 = vst.msk [vmem:[#allocation2 + $0x8] sm:$0xff] %vm32_vm4, %v494_v3  ;;  %33 = vst.msk [vmem:[#allocation2] sm:$0xff] %vm32_vm4, %v494_v3  ;;  %vm145_vm6 = vcmask 57344   ;;  %v496_v39 = vmov 1.0   ;;  %v365_v43 = vlaneseq  ;;  %v385_v6 = vmul.f32 %v345_v63, %v345_v63 }
   0x4   :  { %v471_v8 = vpack.c.bf16 %v557_v5, %v41_v4  ;;  %459 = vmatprep.mubr.msk.f32.mxu1 %vm153_vm2, %v41_v4  ;;  %v574_v11 = vld [vmem:[%s643_s3] sm:$0x1]  ;;  %35 = vst.msk [vmem:[#allocation2 + $0x10] sm:$0xff] %vm32_vm4, %v494_v3  ;;  %36 = vst.msk [vmem:[#allocation2 + $0x18] sm:$0xff] %vm32_vm4, %v494_v3 }
   0x5   :  { %v355_v12 = vsel %vm37_vm3, %v574_v11, 0.0  ;;  %v366_v52 = vshrl.u32 %v365_v43, 7  ;;  %v344_v62 = vld [vmem:[%s645_s4] sm:$0xff] }
   0x6   :  { %472 = vmatpush3.bf16.msra.mxu0 %v471_v8  ;;  %v378_v4 = vmul.f32 2.0, %v344_v62  ;;  %v384_v7 = vmul.f32 %v344_v62, %v344_v62 }
   0x7   :  { %473 = vmatprep.subr.bf16.mxu0 %v492_v0  ;;  %v367_v59 = vsub.s32 0, %v366_v52 }
   0x9   :  { %v263_v41 = vld [vmem:[#allocation3] sm:$0x1] }
   0xa   :  { %475 = vmatpush3.bf16.msra.mxu0 %v474_v9  ;;  %v150_v42 = vld [vmem:[#allocation2 + $0x8] sm:$0xff]  ;;  %v149_v45 = vld [vmem:[#allocation2] sm:$0xff] }
   0xb   :  { %465 = vmatprep.subr.mxu0 %v494_v3  ;;  %v152_v53 = vld [vmem:[#allocation2 + $0x18] sm:$0xff]  ;;  %v151_v54 = vld [vmem:[#allocation2 + $0x10] sm:$0xff] }
   0xd   :  { %455 = vmatmul.mubr.msk.f32.vlgmr.msra.gmra.mrb[0].mxu0 %vm50_vm1, %v43_v10 }
   0xe   :  { %467 = vmatprep.mubr.msk.f32.mxu0 %vm493_vm0, %v494_v3 }
  0x22   :  { %356 = vadd.xlane.f32.xlu0 %v355_v12 }
  0x82   :  { %v48_v13 = vpop.permute.xlu0 %47 }
  0xaf   :  { %v357_v40 = vpop.xlane.xlu0 %356 }
  0xe0   :  { %v120_v14 = vpop.f32.mrb[0].mxu0 }
  0xe1   :  { %v121_v15 = vadd.f32 %v120_v14, %v48_v13  ;;  %v456_v16 = vpop.f32.mrb[1].mxu0 }
  0xe3   :  { %v125_v17 = vsel %vm124_vm5, %v121_v15, -inf }
  0xe4   :  { %v126_v18 = vrot.slane %v125_v17, 4 }
  0xe6   :  { %v127_v19 = vmax.f32 %v125_v17, %v126_v18 }
  0xe8   :  { %v128_v20 = vrot.slane %v127_v19, 2 }
  0xea   :  { %v129_v21 = vmax.f32 %v127_v19, %v128_v20 }
  0xec   :  { %v130_v22 = vrot.slane %v129_v21, 1 }
  0xee   :  { %v131_v23 = vmax.f32 %v129_v21, %v130_v22  ;;  %v349_v21 = vld [vmem:[%s646_s6 + $0x8] sm:$0xff] }
  0xf0   :  { %v132_v24 = vsub.f32 %v121_v15, %v131_v23 }
  0xf2   :  { %v133_v25 = vmul.f32 1.442695, %v132_v24 }
  0xf4   :  { %482 = vpow2.f32 %v133_v25 }
  0xfe   :  { %v483_v26 = vpop.eup %482 }
  0xff   :  { %v135_v27 = vsel %vm124_vm5, %v483_v26, 0.0 }
 0x100   :  { %v136_v28 = vrot.slane %v135_v27, 4 }
 0x102   :  { %v137_v29 = vadd.f32 %v136_v28, %v135_v27  ;;  %v348_v27 = vld [vmem:[%s646_s6] sm:$0xff] }
 0x104   :  { %v138_v30 = vrot.slane %v137_v29, 2 }
 0x106   :  { %v139_v31 = vadd.f32 %v138_v30, %v137_v29 }
 0x108   :  { %v140_v32 = vrot.slane %v139_v31, 1 }
 0x10a   :  { %v141_v33 = vadd.f32 %v140_v32, %v139_v31 }
 0x10c   :  { %484 = vlog2.f32 %v141_v33 }
 0x10d   :  { %486 = vrcp.f32 %v141_v33 }
 0x10e   :  { %488 = vrcp.f32 %v357_v40 }
 0x10f   :  { %490 = vrcp.f32 %v574_v11 }
 0x116   :  { %v485_v34 = vpop.eup %484 }
 0x117   :  { %v487_v35 = vpop.eup %486  ;;  %v143_v36 = vmul.f32 0.6931472, %v485_v34 }
 0x118   :  { %v148_v37 = vmul.f32 %v487_v35, %v483_v26  ;;  %v489_v56 = vpop.eup %488 }
 0x119   :  { %v144_v38 = vadd.f32 %v143_v36, %v131_v23  ;;  %v491_v61 = vpop.eup %490  ;;  %v361_v0 = vmul.f32 8.0, %v489_v56 }
 0x11a   :  { %457 = vmatprep.subr.msk.mxu1 %vm153_vm2, %v148_v37  ;;  %466 = vmatpush3.xpose.msk.msra.mxu0 %vm153_vm2, %v148_v37 }
 0x11b   :  { %146 = vst.msk [vmem:[%s644_s7] sm:$0x1] %vm145_vm6, %v144_v38  ;;  %458 = vmatpush3.xpose.msk.msra.mxu1 %vm153_vm2, %v148_v37 }
 0x11d   :  { %468 = vmatmul.mubr.msk.f32.vlgmr.msra.gmra.mrb[2].mxu0 %vm153_vm2, %v496_v39 }
 0x11e   :  { %460 = vmatmul.mubr.msk.f32.vlgmr.msra.gmra.mrb[0].mxu1 %vm153_vm2, %v557_v5  ;;  %v379_v5 = vmul.f32 2.0, %v345_v63 }
 0x11f   :  { %462 = vmatprep.mubr.msk.f32.mxu1 %vm153_vm2, %v545_v1 }
 0x122   :  { %463 = vmatmul.mubr.msk.f32.gmra.mrb[2].mxu1 %vm153_vm2, %v550_v2 }
 0x1f0   :  { %v333_v44 = vpop.f32.mrb[2].mxu0 }
 0x1f1   :  { %v461_v46 = vpop.f32.mrb[0].mxu1  ;;  %v337_v47 = vadd.f32 %v333_v44, %v263_v41  ;;  %v469_v48 = vpop.f32.mrb[3].mxu0 }
 0x1f2   :  { %v255_v49 = vadd.f32 %v461_v46, %v150_v42  ;;  %v235_v50 = vpop.f32.mrb[1].mxu1  ;;  %v346_v48 = vld [vmem:[%s648_s5] sm:$0xff] }
 0x1f3   :  { %339 = vst.msk [vmem:[#allocation3] sm:$0x1] %vm37_vm3, %v337_v47  ;;  %v254_v51 = vadd.f32 %v235_v50, %v149_v45  ;;  %v347_v45 = vld [vmem:[%s648_s5 + $0x8] sm:$0xff] }
 0x1f4   :  { %260 = vst.msk [vmem:[#allocation2 + $0x8] sm:$0xff] %vm32_vm4, %v255_v49 }
 0x1f5   :  { %259 = vst.msk [vmem:[#allocation2] sm:$0xff] %vm32_vm4, %v254_v51  ;;  %v464_v55 = vpop.f32.mrb[2].mxu1 }
 0x1f6   :  { %v257_v57 = vadd.f32 %v464_v55, %v152_v53  ;;  %v245_v58 = vpop.f32.mrb[3].mxu1 }
 0x1f7   :  { %v256_v60 = vadd.f32 %v245_v58, %v151_v54 }
 0x1f8   :  { %262 = vst.msk [vmem:[#allocation2 + $0x18] sm:$0xff] %vm32_vm4, %v257_v57 }
 0x1f9   :  { %261 = vst.msk [vmem:[#allocation2 + $0x10] sm:$0xff] %vm32_vm4, %v256_v60 }
 0x1fa   :  { %v354_v1 = vld [vmem:[#allocation3] sm:$0x1] }
 0x1fb   :  { %v359_v2 = vmul.f32 %v491_v61, %v354_v1  ;;  %v368_v3 = vrot.slane %v354_v1, %v367_v59  ;;  %v351_v18 = vld [vmem:[#allocation2 + $0x8] sm:$0xff]  ;;  %v394_v31 = vmul.f32 0.125, %v354_v1 }
 0x1fc   :  { %v350_v24 = vld [vmem:[#allocation2] sm:$0xff] }
 0x1fd   :  { %v362_v8 = vsub.f32 %v359_v2, %v361_v0  ;;  %v370_v9 = vmul.f32 %v368_v3, %v344_v62  ;;  %v371_v10 = vmul.f32 %v368_v3, %v345_v63  ;;  %v387_v14 = vmul.f32 %v385_v6, %v368_v3 }
 0x1fe   :  { %v386_v19 = vmul.f32 %v384_v7, %v368_v3  ;;  %v399_v40 = vrot.slane %v394_v31, %v367_v59 }
 0x1ff   :  { %v363_v12 = vmul.f32 -0.125, %v362_v8  ;;  %v353_v13 = vld [vmem:[#allocation2 + $0x18] sm:$0xff] }
 0x200   :  { %v373_v15 = vsub.f32 %v353_v13, %v371_v10  ;;  %v381_v16 = vmul.f32 %v379_v5, %v353_v13  ;;  %v352_v17 = vld [vmem:[#allocation2 + $0x10] sm:$0xff] }
 0x201   :  { %v415_v20 = vmul.f32 0.001, %v363_v12  ;;  %v372_v22 = vsub.f32 %v352_v17, %v370_v9  ;;  %v380_v23 = vmul.f32 %v378_v4, %v352_v17 }
 0x202   :  { %v375_v25 = vmul.f32 -0.125, %v373_v15  ;;  %v383_v26 = vsub.f32 %v351_v18, %v381_v16 }
 0x203   :  { %v416_v28 = vsub.f32 %v574_v11, %v415_v20  ;;  %v374_v29 = vmul.f32 -0.125, %v372_v22  ;;  %v382_v30 = vsub.f32 %v350_v24, %v380_v23 }
 0x204   :  { %v377_v32 = vmul.f32 %v375_v25, %v349_v21  ;;  %v389_v33 = vadd.f32 %v387_v14, %v383_v26 }
 0x205   :  { %417 = vst.msk [vmem:[%s647_s8 + $0x20] sm:$0x1] %vm37_vm3, %v416_v28  ;;  %v376_v34 = vmul.f32 %v374_v29, %v348_v27  ;;  %v388_v35 = vadd.f32 %v386_v19, %v382_v30 }
 0x206   :  { %v391_v36 = vmul.f32 -0.125, %v389_v33  ;;  %v404_v37 = vmul.f32 0.001, %v377_v32 }
 0x207   :  { %v390_v38 = vmul.f32 -0.125, %v388_v35  ;;  %v403_v39 = vmul.f32 0.001, %v376_v34 }
 0x208   :  { %v393_v41 = vmul.f32 %v391_v36, %v349_v21  ;;  %v406_v42 = vsub.f32 %v345_v63, %v404_v37 }
 0x209   :  { %v392_v11 = vmul.f32 %v390_v38, %v348_v27  ;;  %v405_v43 = vsub.f32 %v344_v62, %v403_v39 }
 0x20a   :  { %v402_v44 = vadd.f32 %v399_v40, %v393_v41  ;;  %408 = vst.msk [vmem:[%s647_s8 + $0x8] sm:$0xff] %vm32_vm4, %v406_v42 }
 0x20b   :  { %v401_v46 = vadd.f32 %v399_v40, %v392_v11  ;;  %407 = vst.msk [vmem:[%s647_s8] sm:$0xff] %vm32_vm4, %v405_v43 }
 0x20c   :  { %v410_v47 = vmul.f32 0.001, %v402_v44 }
 0x20d   :  { %v409_v49 = vmul.f32 0.001, %v401_v46 }
 0x20e   :  { %v412_v50 = vsub.f32 %v347_v45, %v410_v47 }
 0x20f   :  { %v411_v51 = vsub.f32 %v346_v48, %v409_v49 }
 0x210   :  { %414 = vst.msk [vmem:[%s647_s8 + $0x18] sm:$0xff] %vm32_vm4, %v412_v50 }
 0x211   :  { %413 = vst.msk [vmem:[%s647_s8 + $0x10] sm:$0xff] %vm32_vm4, %v411_v51 }

// kernel: pseudocounts_forward.3
= control target key start
LH: loop header
LB: loop body
LE: loop exit
PB: predicated region body
PF: predicated region fallthrough
CT: control target
= control target key end

     0   :  { %v225_v2 = vmov 0.0|0.0   ;;  %vm226_vm0 = vmmov 0   ;;  %v227_v5 = vmov 0.0   ;;  %v228_v7 = vmov 0   ;;  %s290_s0 = inlined_call_operand.<no memory space> [shape: f32[1], index: 0, kind: input, shape index: {}]   ;;  %s291_s1 = inlined_call_operand.vmem [shape: f32[16,8], index: 1, kind: input, shape index: {}]   ;;  %s292_s2 = inlined_call_operand.vmem [shape: f32[1,8], index: 2, kind: input, shape index: {}]   ;;  %s293_s3 = inlined_call_operand.vmem [shape: f32[4,32], index: 3, kind: input, shape index: {}]   ;;  %s294_s4 = inlined_call_operand.vmem [shape: f32[4,1], index: 4, kind: input, shape index: {}]   ;;  %s295_s5 = inlined_call_operand.hbm [shape: f32[1,8], index: 5, kind: output, shape index: {}]  }
   0x1   :  { %v22_v0 = vld [vmem:[%s291_s1] sm:$0xff]  ;;  %v23_v1 = vld [vmem:[%s291_s1 + $0x8] sm:$0xff]  ;;  %177 = vmatprep.subr.bf16.mxu0 %v225_v2  ;;  %174 = vmatprep.mubr.msk.f32.mxu0 %vm226_vm0, %v227_v5 }
   0x2   :  { %v24_v3 = vmul.f32 %v22_v0, %v22_v0  ;;  %v25_v4 = vmul.f32 %v23_v1, %v23_v1  ;;  %v27_v6 = vld [vmem:[%s294_s4] sm:$0xf]  ;;  %188 = vset.pattern.permute.xlu0 %v228_v7 }
   0x3   :  { %11 = vsyncpa [#allocation4], 0  ;;  %30 = vperm.xlu0 %188, %v27_v6   ;;  %v181_v9 = vpack.c.bf16 %v23_v1, %v22_v0  ;;  %v26_v10 = vld [vmem:[%s293_s3] sm:$0xf]  ;;  %vm33_vm1 = vcmask 261120   ;;  %vm107_vm2 = vcmask 60416   ;;  %v131_v32 = vstv %s290_s0 }
   0x4   :  { %v178_v8 = vpack.c.bf16 %v25_v4, %v24_v3  ;;  %v128_v36 = vld [vmem:[%s292_s2] sm:$0x1]  ;;  %s229_s0 = smov [#allocation3]   ;;  %vm143_vm3 = vcmask 57344  }
   0x5   :  { %s151_s27 = sshll.u32 %s229_s0, 4  ;;  %s152_s27 = int_to_ptr.vmem [resolvable:$true] %s151_s27 }
   0x6   :  { %179 = vmatpush3.bf16.msra.mxu0 %v178_v8  ;;  %s201_s2 = scalar_lea.vmem %s152_s27, 16  ;;  %s205_s28 = scalar_lea.vmem %s152_s27, 32 }
   0x7   :  { %180 = vmatprep.subr.bf16.mxu0 %v225_v2  ;;  %p202_p0 = scmp.ne.s32.totalorder %s152_s27, %s201_s2  ;;  %p206_p1 = scmp.lt.s32.totalorder %s152_s27, %s152_s27 }
   0x8   :  { %p207_p2 = scmp.lt.s32.totalorder %s205_s28, %s201_s2 }
   0xa   :  { %182 = vmatpush3.bf16.msra.mxu0 %v181_v9  ;;  %p208_p3 = por %p207_p2, %p206_p1 }
   0xc   :  { %p209_p4 = pnand %p208_p3, %p202_p0 }
   0xd   :  { %175 = vmatmul.mubr.msk.f32.vlgmr.msra.gmra.mrb[0].mxu0 %vm33_vm1, %v26_v10 }
  0x82   :  { %v31_v11 = vpop.permute.xlu0 %30 }
  0xe0   :  { %v103_v12 = vpop.f32.mrb[0].mxu0 }
  0xe1   :  { %v104_v13 = vadd.f32 %v103_v12, %v31_v11  ;;  %v176_v14 = vpop.f32.mrb[1].mxu0 }
  0xe3   :  { %v108_v15 = vsel %vm107_vm2, %v104_v13, -inf }
  0xe4   :  { %v109_v16 = vrot.slane %v108_v15, 4 }
  0xe6   :  { %v110_v17 = vmax.f32 %v108_v15, %v109_v16 }
  0xe8   :  { %v111_v18 = vrot.slane %v110_v17, 2 }
  0xea   :  { %v112_v19 = vmax.f32 %v110_v17, %v111_v18 }
  0xec   :  { %v113_v20 = vrot.slane %v112_v19, 1 }
  0xee   :  { %v114_v21 = vmax.f32 %v112_v19, %v113_v20 }
  0xf0   :  { %v115_v22 = vsub.f32 %v104_v13, %v114_v21 }
  0xf2   :  { %v116_v23 = vmul.f32 1.442695, %v115_v22 }
  0xf4   :  { %189 = vpow2.f32 %v116_v23 }
  0xfe   :  { %v190_v24 = vpop.eup %189 }
  0xff   :  { %v118_v25 = vsel %vm107_vm2, %v190_v24, 0.0 }
 0x100   :  { %v119_v26 = vrot.slane %v118_v25, 4 }
 0x102   :  { %v120_v27 = vadd.f32 %v119_v26, %v118_v25 }
 0x104   :  { %v121_v28 = vrot.slane %v120_v27, 2 }
 0x106   :  { %v122_v29 = vadd.f32 %v121_v28, %v120_v27 }
 0x108   :  { %v123_v30 = vrot.slane %v122_v29, 1 }
 0x10a   :  { %v124_v31 = vadd.f32 %v123_v30, %v122_v29 }
 0x10c   :  { %191 = vlog2.f32 %v124_v31 }
 0x10d   :  { %193 = vrsqrt.f32 %v131_v32 }
 0x116   :  { %v192_v33 = vpop.eup %191 }
 0x117   :  { %v126_v34 = vmul.f32 0.6931472, %v192_v33  ;;  %v194_v35 = vpop.eup %193 }
 0x118   :  { %v133_v39 = vmul.f32 0.1, %v194_v35 }
 0x119   :  { %v127_v37 = vadd.f32 %v126_v34, %v114_v21 }
 0x11b   :  { %v129_v38 = vsub.f32 %v127_v37, %v128_v36 }
 0x11d   :  { %v134_v40 = vmax.f32 %v129_v38, 0.0 }
 0x11f   :  { %v135_v41 = vmul.f32 %v134_v40, %v133_v39 }
 0x121   :  { %v136_v42 = vmul.f32 1.442695, %v135_v41 }
 0x123   :  { %195 = vpow2.f32 %v136_v42 }
 0x12d   :  { %v196_v43 = vpop.eup %195 }
 0x12e   :  { %v160_v44 = vadd.f32 -1.0, %v196_v43 }
 0x130   :  { %v139_v45 = vmax.f32 %v160_v44, 1e-30 }
 0x132   :  { %197 = vrsqrt.f32 %v139_v45 }
 0x13c   :  { %v198_v46 = vpop.eup %197 }
 0x13d   :  { %v141_v47 = vadd.f32 1e-12, %v198_v46 }
 0x13f   :  { %199 = vrcp.f32 %v141_v47 }
 0x149   :  { %v200_v48 = vpop.eup %199 }
 0x14a   :  { %144 = vst.msk [vmem:[#allocation3] sm:$0x1] %vm143_vm3, %v200_v48 }
 0x14b   :  { %212 = shalt.err (!%p209_p4)
}
 0x14c   :  { %s213_s6 = scalar_lea.hbm %s295_s5, 16 }
 0x14d   :  { %p214_p5 = scmp.ne.s32.totalorder %s295_s5, %s213_s6  ;;  %p217_p6 = scmp.lt.u32.totalorder %s213_s6, %s295_s5 }
 0x14f   :  { %p219_p7 = pnand %p217_p6, %p214_p5 }
 0x151   :  { %222 = shalt.err (!%p219_p7)
}
 0x152   :  { %154 = dma.vmem_to_hbm [thread:$0]  %s152_s27, 16, %s295_s5, [#allocation4]  }
 0x153   :  { %223 = dma.done.wait [#allocation4], 16  }
 0x154   :  { %224 = vsyncadd [#allocation4], 4294967280 }
 0x155   :  { %158 = vsyncpa [#allocation4], 1 }

</bundles_post_ra>
